<compile_context>
chip_gen: v5e
topology: v5e:2x2
jax: 0.10.0
libtpu: 0.0.40
codegen_flags: <defaults>
</compile_context>

<pallas_src>
import functools

import jax
import jax.numpy as jnp
from jax.experimental import pallas as pl
from jax.experimental.pallas import tpu as pltpu


DIMS = [(9, 32), (32, 16), (16, 8), (8, 2)]


def titanic_kernel(x_ref,
                   w1_ref, b1_ref,
                   w2_ref, b2_ref,
                   w3_ref, b3_ref,
                   w4_ref, b4_ref,
                   o_ref):
    # Layer 1: (TILE_B, 9) @ (9, 32) + (1, 32) -> relu
    h = jnp.dot(x_ref[...], w1_ref[...], preferred_element_type=jnp.float32)
    h = jnp.maximum(h + b1_ref[...], 0.0)
    # Layer 2: (TILE_B, 32) @ (32, 16) + (1, 16) -> relu
    h = jnp.dot(h, w2_ref[...], preferred_element_type=jnp.float32)
    h = jnp.maximum(h + b2_ref[...], 0.0)
    # Layer 3: (TILE_B, 16) @ (16, 8) + (1, 8) -> relu
    h = jnp.dot(h, w3_ref[...], preferred_element_type=jnp.float32)
    h = jnp.maximum(h + b3_ref[...], 0.0)
    # Layer 4: (TILE_B, 8) @ (8, 2) + (1, 2) -> sigmoid
    z = jnp.dot(h, w4_ref[...], preferred_element_type=jnp.float32)
    z = z + b4_ref[...]
    o_ref[...] = jax.nn.sigmoid(z)


def _round_up(n, m):
    return ((n + m - 1) // m) * m


@functools.partial(jax.jit, static_argnames=("tile_b",))
def titanic_net(x, params, *, tile_b=512):
    """x: (B, 9) f32; params: list of (W, b) with W=(in, out), b=(1, out)."""
    B = x.shape[0]

    # Pick a batch tile: multiple of 8 (sublane), at most `tile_b`.
    tb = min(tile_b, _round_up(B, 8))
    tb = _round_up(tb, 8)
    B_pad = _round_up(B, tb)
    if B_pad != B:
        x = jnp.pad(x, ((0, B_pad - B), (0, 0)))

    flat = [x]
    for w, b in params:
        flat += [w, b]

    grid = (B_pad // tb,)

    # x / out are tiled over the batch; weights & biases are full blocks with a
    # constant index_map so they are fetched once and stay VMEM-resident.
    in_specs = [pl.BlockSpec((tb, 9), lambda i: (i, 0))]
    for w, b in params:
        in_specs.append(pl.BlockSpec(w.shape, lambda i: (0, 0)))
        in_specs.append(pl.BlockSpec(b.shape, lambda i: (0, 0)))
    out_spec = pl.BlockSpec((tb, 2), lambda i: (i, 0))

    # Advisory cost hint for XLA scheduling around the custom call.
    flops = 2 * B_pad * sum(fi * fo for fi, fo in DIMS)
    weight_bytes = sum(w.size * 4 + b.size * 4 for w, b in params)
    cost = pl.CostEstimate(
        flops=flops,
        transcendentals=2 * B_pad,                     # exp in the sigmoid
        bytes_accessed=B_pad * 9 * 4 + B_pad * 2 * 4 + weight_bytes,
    )

    out = pl.pallas_call(
        titanic_kernel,
        out_shape=jax.ShapeDtypeStruct((B_pad, 2), jnp.float32),
        grid=grid,
        in_specs=in_specs,
        out_specs=out_spec,
        compiler_params=pltpu.CompilerParams(
            dimension_semantics=("parallel",),
        ),
        cost_estimate=cost,
    )(*flat)

    return out[:B]


def init_params(key):
    """Deterministic init matching PyTorch nn.Linear default:
    U(-1/sqrt(fan_in), 1/sqrt(fan_in)) for both weight and bias."""
    params = []
    for (fan_in, fan_out) in DIMS:
        key, kw, kb = jax.random.split(key, 3)
        bound = 1.0 / (fan_in ** 0.5)
        w = jax.random.uniform(kw, (fan_in, fan_out), jnp.float32, -bound, bound)
        b = jax.random.uniform(kb, (1, fan_out), jnp.float32, -bound, bound)
        params.append((w, b))
    return params


def reference_forward(x, params):
    h = x
    for i, (w, b) in enumerate(params):
        h = h @ w + b
        h = jnp.maximum(h, 0.0) if i < 3 else jax.nn.sigmoid(h)
    return h


if __name__ == "__main__":
    key = jax.random.PRNGKey(0)
    key, kx1, kx2 = jax.random.split(key, 3)
    params = init_params(key)

    # Small test 1: batch=8, single grid step.
    x1 = jax.random.normal(kx1, (8, 9), jnp.float32)
    out1 = jax.block_until_ready(titanic_net(x1, params))
    ref1 = reference_forward(x1, params)
    assert out1.shape == (8, 2)
    assert jnp.allclose(out1, ref1, atol=1e-5, rtol=1e-5), "mismatch (batch=8)"

    # Small test 2: batch=20 with tile_b=8 -> exercises padding + multi-step grid.
    x2 = jax.random.normal(kx2, (20, 9), jnp.float32)
    out2 = jax.block_until_ready(titanic_net(x2, params, tile_b=8))
    ref2 = reference_forward(x2, params)
    assert out2.shape == (20, 2)
    assert jnp.allclose(out2, ref2, atol=1e-5, rtol=1e-5), "mismatch (batch=20)"

    print("KERNEL_OK")
</pallas_src>

<mosaic_0001>
module attributes {stable_mosaic.version = 11 : i64} {
  func.func @titanic_kernel(%arg0: i32, %arg1: memref<8x9xf32, #tpu.memory_space<vmem>>, %arg2: memref<9x32xf32, #tpu.memory_space<vmem>>, %arg3: memref<1x32xf32, #tpu.memory_space<vmem>>, %arg4: memref<32x16xf32, #tpu.memory_space<vmem>>, %arg5: memref<1x16xf32, #tpu.memory_space<vmem>>, %arg6: memref<16x8xf32, #tpu.memory_space<vmem>>, %arg7: memref<1x8xf32, #tpu.memory_space<vmem>>, %arg8: memref<8x2xf32, #tpu.memory_space<vmem>>, %arg9: memref<1x2xf32, #tpu.memory_space<vmem>>, %arg10: memref<8x2xf32, #tpu.memory_space<vmem>>) attributes {dimension_semantics = [#tpu.dimension_semantics<parallel>], iteration_bounds = array<i64: 1>, scalar_prefetch = 0 : i64, scratch_operands = 0 : i64, tpu.core_type = #tpu.core_type<tc>, window_params = [{transform_indices = @transform_0, window_bounds = array<i64: 8, 9>}, {pipeline_mode = #tpu.pipeline_mode<synchronous>, transform_indices = @transform_1, window_bounds = array<i64: 9, 32>}, {pipeline_mode = #tpu.pipeline_mode<synchronous>, transform_indices = @transform_2, window_bounds = array<i64: 1, 32>}, {pipeline_mode = #tpu.pipeline_mode<synchronous>, transform_indices = @transform_3, window_bounds = array<i64: 32, 16>}, {pipeline_mode = #tpu.pipeline_mode<synchronous>, transform_indices = @transform_4, window_bounds = array<i64: 1, 16>}, {pipeline_mode = #tpu.pipeline_mode<synchronous>, transform_indices = @transform_5, window_bounds = array<i64: 16, 8>}, {pipeline_mode = #tpu.pipeline_mode<synchronous>, transform_indices = @transform_6, window_bounds = array<i64: 1, 8>}, {pipeline_mode = #tpu.pipeline_mode<synchronous>, transform_indices = @transform_7, window_bounds = array<i64: 8, 2>}, {pipeline_mode = #tpu.pipeline_mode<synchronous>, transform_indices = @transform_8, window_bounds = array<i64: 1, 2>}, {transform_indices = @transform_9, window_bounds = array<i64: 8, 2>}]} {
    %c0 = arith.constant 0 : index
    %c0_0 = arith.constant 0 : index
    %0 = vector.load %arg1[%c0, %c0_0] : memref<8x9xf32, #tpu.memory_space<vmem>>, vector<8x9xf32>
    %c0_1 = arith.constant 0 : index
    %c0_2 = arith.constant 0 : index
    %1 = vector.load %arg2[%c0_1, %c0_2] : memref<9x32xf32, #tpu.memory_space<vmem>>, vector<9x32xf32>
    %cst = arith.constant dense<0.000000e+00> : vector<8x32xf32>
    %2 = tpu.matmul %0, %1, %cst {dimension_numbers = #tpu.dot_dimension_numbers<[1], [0], [0], [1], [0, 0, 1, 1], [], []>} : vector<8x9xf32>, vector<9x32xf32>, vector<8x32xf32> -> vector<8x32xf32>
    %c0_3 = arith.constant 0 : index
    %c0_4 = arith.constant 0 : index
    %3 = vector.load %arg3[%c0_3, %c0_4] : memref<1x32xf32, #tpu.memory_space<vmem>>, vector<1x32xf32>
    %4 = vector.broadcast %3 : vector<1x32xf32> to vector<8x32xf32>
    %5 = arith.addf %2, %4 : vector<8x32xf32>
    %cst_5 = arith.constant 0.000000e+00 : f32
    %6 = vector.broadcast %cst_5 : f32 to vector<8x32xf32>
    %7 = arith.maximumf %5, %6 : vector<8x32xf32>
    %c0_6 = arith.constant 0 : index
    %c0_7 = arith.constant 0 : index
    %8 = vector.load %arg4[%c0_6, %c0_7] : memref<32x16xf32, #tpu.memory_space<vmem>>, vector<32x16xf32>
    %cst_8 = arith.constant dense<0.000000e+00> : vector<8x16xf32>
    %9 = tpu.matmul %7, %8, %cst_8 {dimension_numbers = #tpu.dot_dimension_numbers<[1], [0], [0], [1], [0, 0, 1, 1], [], []>} : vector<8x32xf32>, vector<32x16xf32>, vector<8x16xf32> -> vector<8x16xf32>
    %c0_9 = arith.constant 0 : index
    %c0_10 = arith.constant 0 : index
    %10 = vector.load %arg5[%c0_9, %c0_10] : memref<1x16xf32, #tpu.memory_space<vmem>>, vector<1x16xf32>
    %11 = vector.broadcast %10 : vector<1x16xf32> to vector<8x16xf32>
    %12 = arith.addf %9, %11 : vector<8x16xf32>
    %cst_11 = arith.constant 0.000000e+00 : f32
    %13 = vector.broadcast %cst_11 : f32 to vector<8x16xf32>
    %14 = arith.maximumf %12, %13 : vector<8x16xf32>
    %c0_12 = arith.constant 0 : index
    %c0_13 = arith.constant 0 : index
    %15 = vector.load %arg6[%c0_12, %c0_13] : memref<16x8xf32, #tpu.memory_space<vmem>>, vector<16x8xf32>
    %cst_14 = arith.constant dense<0.000000e+00> : vector<8x8xf32>
    %16 = tpu.matmul %14, %15, %cst_14 {dimension_numbers = #tpu.dot_dimension_numbers<[1], [0], [0], [1], [0, 0, 1, 1], [], []>} : vector<8x16xf32>, vector<16x8xf32>, vector<8x8xf32> -> vector<8x8xf32>
    %c0_15 = arith.constant 0 : index
    %c0_16 = arith.constant 0 : index
    %17 = vector.load %arg7[%c0_15, %c0_16] : memref<1x8xf32, #tpu.memory_space<vmem>>, vector<1x8xf32>
    %18 = vector.broadcast %17 : vector<1x8xf32> to vector<8x8xf32>
    %19 = arith.addf %16, %18 : vector<8x8xf32>
    %cst_17 = arith.constant 0.000000e+00 : f32
    %20 = vector.broadcast %cst_17 : f32 to vector<8x8xf32>
    %21 = arith.maximumf %19, %20 : vector<8x8xf32>
    %c0_18 = arith.constant 0 : index
    %c0_19 = arith.constant 0 : index
    %22 = vector.load %arg8[%c0_18, %c0_19] : memref<8x2xf32, #tpu.memory_space<vmem>>, vector<8x2xf32>
    %cst_20 = arith.constant dense<0.000000e+00> : vector<8x2xf32>
    %23 = tpu.matmul %21, %22, %cst_20 {dimension_numbers = #tpu.dot_dimension_numbers<[1], [0], [0], [1], [0, 0, 1, 1], [], []>} : vector<8x8xf32>, vector<8x2xf32>, vector<8x2xf32> -> vector<8x2xf32>
    %c0_21 = arith.constant 0 : index
    %c0_22 = arith.constant 0 : index
    %24 = vector.load %arg9[%c0_21, %c0_22] : memref<1x2xf32, #tpu.memory_space<vmem>>, vector<1x2xf32>
    %25 = vector.broadcast %24 : vector<1x2xf32> to vector<8x2xf32>
    %26 = arith.addf %23, %25 : vector<8x2xf32>
    %27 = arith.negf %26 : vector<8x2xf32>
    %28 = math.exp %27 : vector<8x2xf32>
    %cst_23 = arith.constant 1.000000e+00 : f32
    %29 = vector.broadcast %cst_23 : f32 to vector<8x2xf32>
    %30 = arith.addf %29, %28 : vector<8x2xf32>
    %31 = arith.divf %29, %30 : vector<8x2xf32>
    %c0_24 = arith.constant 0 : index
    %c0_25 = arith.constant 0 : index
    %32 = vector.load %arg10[%c0_24, %c0_25] : memref<8x2xf32, #tpu.memory_space<vmem>>, vector<8x2xf32>
    tpu.vector_store %arg10[%c0_24, %c0_25], %31 {strides = array<i32>} : memref<8x2xf32, #tpu.memory_space<vmem>>, vector<8x2xf32>,
    return
  }
  func.func @transform_0(%arg0: i32) -> (i32, i32) {
    %c0_i32 = arith.constant 0 : i32
    %c0_i32_0 = arith.constant 0 : i32
    return %arg0, %c0_i32 : i32, i32
  }
  func.func @transform_1(%arg0: i32) -> (i32, i32) {
    %c0_i32 = arith.constant 0 : i32
    %c0_i32_0 = arith.constant 0 : i32
    %c0_i32_1 = arith.constant 0 : i32
    return %c0_i32, %c0_i32_0 : i32, i32
  }
  func.func @transform_2(%arg0: i32) -> (i32, i32) {
    %c0_i32 = arith.constant 0 : i32
    %c0_i32_0 = arith.constant 0 : i32
    %c0_i32_1 = arith.constant 0 : i32
    return %c0_i32, %c0_i32_0 : i32, i32
  }
  func.func @transform_3(%arg0: i32) -> (i32, i32) {
    %c0_i32 = arith.constant 0 : i32
    %c0_i32_0 = arith.constant 0 : i32
    %c0_i32_1 = arith.constant 0 : i32
    return %c0_i32, %c0_i32_0 : i32, i32
  }
  func.func @transform_4(%arg0: i32) -> (i32, i32) {
    %c0_i32 = arith.constant 0 : i32
    %c0_i32_0 = arith.constant 0 : i32
    %c0_i32_1 = arith.constant 0 : i32
    return %c0_i32, %c0_i32_0 : i32, i32
  }
  func.func @transform_5(%arg0: i32) -> (i32, i32) {
    %c0_i32 = arith.constant 0 : i32
    %c0_i32_0 = arith.constant 0 : i32
    %c0_i32_1 = arith.constant 0 : i32
    return %c0_i32, %c0_i32_0 : i32, i32
  }
  func.func @transform_6(%arg0: i32) -> (i32, i32) {
    %c0_i32 = arith.constant 0 : i32
    %c0_i32_0 = arith.constant 0 : i32
    %c0_i32_1 = arith.constant 0 : i32
    return %c0_i32, %c0_i32_0 : i32, i32
  }
  func.func @transform_7(%arg0: i32) -> (i32, i32) {
    %c0_i32 = arith.constant 0 : i32
    %c0_i32_0 = arith.constant 0 : i32
    %c0_i32_1 = arith.constant 0 : i32
    return %c0_i32, %c0_i32_0 : i32, i32
  }
  func.func @transform_8(%arg0: i32) -> (i32, i32) {
    %c0_i32 = arith.constant 0 : i32
    %c0_i32_0 = arith.constant 0 : i32
    %c0_i32_1 = arith.constant 0 : i32
    return %c0_i32, %c0_i32_0 : i32, i32
  }
  func.func @transform_9(%arg0: i32) -> (i32, i32) {
    %c0_i32 = arith.constant 0 : i32
    %c0_i32_0 = arith.constant 0 : i32
    return %arg0, %c0_i32 : i32, i32
  }
}

</mosaic_0001>

<bundles_post_ra>
// kernel: titanic_net.1
= control target key start
LH: loop header
LB: loop body
LE: loop exit
PB: predicated region body
PF: predicated region fallthrough
CT: control target
= control target key end

     0   :  { %vm43_vm0 = vcmask 1040384   ;;  %vm39_vm1 = vcmask 72704   ;;  %vm76_vm2 = vcmask 261120   ;;  %vm107_vm3 = vcmask 130048   ;;  %s295_s1 = inlined_call_operand.vmem [shape: f32[9,32], index: 1, kind: input, shape index: {}]   ;;  %s296_s0 = inlined_call_operand.vmem [shape: f32[8,9], index: 0, kind: input, shape index: {}]   ;;  %s297_s3 = inlined_call_operand.vmem [shape: f32[32,16], index: 3, kind: input, shape index: {}]   ;;  %s298_s2 = inlined_call_operand.vmem [shape: f32[1,32], index: 2, kind: input, shape index: {}]   ;;  %s299_s4 = inlined_call_operand.vmem [shape: f32[1,16], index: 4, kind: input, shape index: {}]   ;;  %s300_s6 = inlined_call_operand.vmem [shape: f32[1,8], index: 6, kind: input, shape index: {}]   ;;  %s301_s5 = inlined_call_operand.vmem [shape: f32[16,8], index: 5, kind: input, shape index: {}]   ;;  %s302_s8 = inlined_call_operand.vmem [shape: f32[1,2], index: 8, kind: input, shape index: {}]   ;;  %s303_s7 = inlined_call_operand.vmem [shape: f32[8,2], index: 7, kind: input, shape index: {}]   ;;  %s304_s9 = inlined_call_operand.vmem [shape: f32[8,2], index: 9, kind: output, shape index: {}]  }
   0x1   :  { %v34_v0 = vld [vmem:[%s295_s1 + $0x8] sm:$0x1]  ;;  %v33_v1 = vld [vmem:[%s295_s1] sm:$0xff]  ;;  %v71_v3 = vld [vmem:[%s297_s3 + $0x18] sm:$0xff]  ;;  %vm137_vm4 = vcmask 64512   ;;  %vm180_vm8 = vcmask 15360  }
   0x2   :  { %186 = vmatpush.msk.msra.mxu0 %vm43_vm0, %v34_v0  ;;  %v32_v2 = vld [vmem:[%s296_s0] sm:$0xff]  ;;  %92 = vmatpush.msra.mxu1 %v71_v3  ;;  %v70_v4 = vld [vmem:[%s297_s3 + $0x10] sm:$0xff]  ;;  %v69_v5 = vld [vmem:[%s297_s3 + $0x8] sm:$0xff] }
   0x3   :  { %v68_v6 = vld [vmem:[%s297_s3] sm:$0xff]  ;;  %v102_v11 = vld [vmem:[%s301_s5 + $0x8] sm:$0xff] }
   0x4   :  { %62 = vmatpush.msra.mxu0 %v33_v1  ;;  %93 = vmatpush.msra.mxu1 %v70_v4  ;;  %v192_v7 = vld [vmem:[%s298_s2] ss:$0 sm:$0xff] }
   0x5   :  { %187 = vmatmul.msk.f32.vlgmr.msra.gmra.mxu0 %vm39_vm1, %v32_v2  ;;  %125 = vmatpush.msra.mxu2 %v102_v11  ;;  %v101_v12 = vld [vmem:[%s301_s5] sm:$0xff] }
   0x6   :  { %94 = vmatpush.msra.mxu1 %v69_v5  ;;  %v193_v13 = vld [vmem:[%s299_s4] ss:$0 sm:$0xff] }
   0x7   :  { %126 = vmatpush.msra.mxu2 %v101_v12  ;;  %v132_v17 = vld [vmem:[%s303_s7] sm:$0xff] }
   0x8   :  { %95 = vmatpush.msra.mxu1 %v68_v6  ;;  %156 = vmatpush.msra.mxu3 %v132_v17  ;;  %v194_v18 = vld [vmem:[%s300_s6] ss:$0 sm:$0xff] }
   0x9   :  { %v195_v22 = vld [vmem:[%s302_s8] ss:$0 sm:$0xff] }
  0x82   :  { %v64_v8 = vpop.f32.mrf.mxu0 }
  0x83   :  { %v65_v9 = vadd.f32 %v192_v7, %v64_v8 }
  0x85   :  { %v67_v10 = vmax.f32 %v65_v9, 0.0 }
  0x87   :  { %188 = vmatmul.msk.f32.vlgmr.msra.gmra.mxu1 %vm76_vm2, %v67_v10 }
 0x104   :  { %v97_v14 = vpop.f32.mrf.mxu1 }
 0x105   :  { %v98_v15 = vadd.f32 %v193_v13, %v97_v14 }
 0x107   :  { %v100_v16 = vmax.f32 %v98_v15, 0.0 }
 0x109   :  { %189 = vmatmul.msk.f32.vlgmr.msra.gmra.mxu2 %vm107_vm3, %v100_v16 }
 0x18c   :  { %v128_v19 = vpop.f32.mrf.mxu2 }
 0x18d   :  { %v129_v20 = vadd.f32 %v194_v18, %v128_v19 }
 0x18f   :  { %v131_v21 = vmax.f32 %v129_v20, 0.0 }
 0x191   :  { %190 = vmatmul.msk.f32.vlgmr.msra.gmra.mxu3 %vm137_vm4, %v131_v21 }
 0x214   :  { %v158_v23 = vpop.f32.mrf.mxu3 }
 0x215   :  { %v159_v24 = vadd.f32 %v195_v22, %v158_v23 }
 0x217   :  { %v191_v25 = vmul.f32 -1.442695, %v159_v24 }
 0x219   :  { %196 = vpow2.f32 %v191_v25 }
 0x21f   :  { %v197_v26 = vpop.eup %196 }
 0x220   :  { %v164_v27 = vadd.f32 1.0, %v197_v26 }
 0x222   :  { %198 = vrcp.f32 %v164_v27  ;;  %v176_v31 = vand.u32 2147483648, %v164_v27  ;;  %v174_v33 = vand.u32 2147483647, %v164_v27  ;;  %vm170_vm6 = vweird.f32 %v164_v27 }
 0x224   :  { %v177_v35 = vor.u32 1.1754944e-38, %v176_v31  ;;  %vm175_vm9 = vcmp.eq.f32.partialorder %v174_v33, 8.507059e+37 }
 0x228   :  { %v199_v28 = vpop.eup %198 }
 0x229   :  { %v166_v29 = vmul.f32 %v199_v28, %v164_v27  ;;  %vm171_vm5 = vweird.f32 %v199_v28 }
 0x22a   :  { %vm172_vm7 = vmor %vm170_vm6, %vm171_vm5 }
 0x22b   :  { %v167_v30 = vsub.f32 1.0, %v166_v29 }
 0x22d   :  { %v168_v32 = vmul.f32 %v199_v28, %v167_v30 }
 0x22f   :  { %v169_v34 = vadd.f32 %v199_v28, %v168_v32 }
 0x231   :  { %v173_v36 = vsel %vm172_vm7, %v199_v28, %v169_v34 }
 0x232   :  { %v178_v37 = vsel %vm175_vm9, %v177_v35, %v173_v36 }
 0x233   :  { %181 = vst.msk [vmem:[%s304_s9] sm:$0xff] %vm180_vm8, %v178_v37 }

</bundles_post_ra>
